<compile_context>
chip_gen: v6e
topology: v6e:2x2x1
jax: 0.10.0
libtpu: 0.0.40
codegen_flags: <defaults>
</compile_context>

<pallas_src>
import functools

import jax
import jax.numpy as jnp
from jax.experimental import pallas as pl
from jax.experimental.pallas import tpu as pltpu

MAX_TB = 512                      # batch-tile cap (rows)
MAX_TK = 4096                     # vocab (reduction) tile cap (multiple of 128)
WEIGHT_RESIDENT_MAX_BYTES = 8 * 1024 * 1024   # keep weight VMEM-resident below this
NEG_BIG = -1e30                   # finite "-inf" baked into padded label lanes


def _round_up(x, m):
    return (x + m - 1) // m * m


def _choose_tk(vocab):
    # Single full-width block when the whole vocab fits one tile (no tail mask
    # needed); otherwise a 128-aligned chunk with the tail masked in-kernel.
    if vocab <= MAX_TK:
        return vocab
    return MAX_TK


def _choose_tb(batch):
    if batch <= 8:
        return batch                                  # full-dim block
    tb = min(MAX_TB, (batch // 8) * 8)                # multiple of 8, <= batch
    if batch > 16:
        # v7x: guarantee >= 2 blocks on the "parallel" batch axis so both
        # TensorCores (and both HBM pipes) are used.  Harmless on v5e/v6e.
        half = max(_round_up(-(-batch // 2), 16), 16)
        tb = min(tb, half)
    return tb


def bow_logsoftmax_kernel(x_ref, wt_ref, b_ref, o_ref, *, vocab, tk):
    # x:  (tb, tk)        input dtype (f32), cast to weight dtype in-kernel
    # wt: (V_pad, L_pad)  resident, or (tk, L_pad) streamed per K chunk
    # b:  (1, L_pad)      f32, padded lanes carry -1e30
    # o:  (tb, L_pad)     f32, doubles as the accumulator across the k axis
    k = pl.program_id(1)

    @pl.when(k == 0)
    def _():
        o_ref[...] = jnp.zeros_like(o_ref)

    x = x_ref[...]
    if vocab % tk != 0:
        # Partial edge blocks are NOT zero-filled: mask the vocab tail so
        # garbage columns cannot corrupt the reduction.
        col = jax.lax.broadcasted_iota(jnp.int32, x.shape, 1) + k * tk
        x = jnp.where(col < vocab, x, jnp.zeros_like(x))
    x = x.astype(wt_ref.dtype)                 # free VPU cast; kernel is DMA-bound

    if wt_ref.shape[0] == tk:                  # streamed chunk (or single chunk)
        w = wt_ref[...]
    else:                                      # VMEM-resident weight: slice K chunk
        w = wt_ref[pl.ds(pl.multiple_of(k * tk, tk), tk), :]

    o_ref[...] += jnp.dot(x, w, preferred_element_type=jnp.float32)

    @pl.when(k == pl.num_programs(1) - 1)
    def _():
        # Padded label lanes carry bias = -1e30 -> drop out of max / exp-sum.
        logits = o_ref[...] + b_ref[...]
        m = jnp.max(logits, axis=-1, keepdims=True)
        shifted = logits - m
        lse = jnp.log(jnp.sum(jnp.exp(shifted), axis=-1, keepdims=True))
        o_ref[...] = shifted - lse


def prepare_params(weight, bias, *, compute_dtype=jnp.float32):
    """One-time prep: transpose torch-layout (L, V) -> (V_pad, L_pad), pad the
    vocab rows to the K-tile, pad labels to 8 (f32) / 16 (bf16) lanes, and bake
    -1e30 into the padded bias lanes (f32)."""
    num_labels, vocab = weight.shape
    tk = _choose_tk(vocab)
    v_pad = _round_up(vocab, tk)
    pack = 4 // jnp.dtype(compute_dtype).itemsize        # 1 for f32, 2 for bf16
    l_pad = _round_up(max(num_labels, 1), 8 * pack)

    wt = jnp.zeros((v_pad, l_pad), dtype=compute_dtype)
    wt = wt.at[:vocab, :num_labels].set(jnp.asarray(weight).T.astype(compute_dtype))

    b = jnp.full((1, l_pad), NEG_BIG, dtype=jnp.float32)
    b = b.at[0, :num_labels].set(jnp.asarray(bias).astype(jnp.float32))
    return wt, b


@functools.partial(jax.jit, static_argnames=("num_labels",))
def bow_classifier_forward(bow_vec, wt_padded, bias_padded, num_labels):
    """bow_vec: (B, V) f32 (fed to the kernel as-is); wt_padded: (V_pad, L_pad);
    bias_padded: (1, L_pad) f32.  Returns log_softmax(bow_vec @ W.T + b)."""
    batch, vocab = bow_vec.shape
    v_pad, l_pad = wt_padded.shape
    tk = _choose_tk(vocab)
    tb = _choose_tb(batch)
    assert v_pad == _round_up(vocab, tk), "weight was prepared for a different vocab"
    assert bias_padded.shape == (1, l_pad)

    grid = (pl.cdiv(batch, tb), pl.cdiv(vocab, tk))

    wt_bytes = v_pad * l_pad * jnp.dtype(wt_padded.dtype).itemsize
    if wt_bytes <= WEIGHT_RESIDENT_MAX_BYTES:
        # Whole weight lives in VMEM for the whole call (one HBM pass total).
        w_spec = pl.BlockSpec((v_pad, l_pad), lambda i, k: (0, 0))
    else:
        # Huge vocab fallback: stream one K chunk per grid step.
        w_spec = pl.BlockSpec((tk, l_pad), lambda i, k: (k, 0))

    kernel = functools.partial(bow_logsoftmax_kernel, vocab=vocab, tk=tk)

    out = pl.pallas_call(
        kernel,
        out_shape=jax.ShapeDtypeStruct((batch, l_pad), jnp.float32),
        grid_spec=pltpu.PrefetchScalarGridSpec(
            num_scalar_prefetch=0,
            grid=grid,
            in_specs=[
                pl.BlockSpec((tb, tk), lambda i, k: (i, k)),   # x tile (no wrapper copy)
                w_spec,                                        # weight (resident/streamed)
                pl.BlockSpec((1, l_pad), lambda i, k: (0, 0)), # bias (resident)
            ],
            out_specs=pl.BlockSpec((tb, l_pad), lambda i, k: (i, 0)),
        ),
        compiler_params=pltpu.CompilerParams(
            dimension_semantics=("parallel", "arbitrary"),
            vmem_limit_bytes=48 * 1024 * 1024,   # tile totals < 40 MiB -> safe on v7x too
        ),
    )(bow_vec, wt_padded, bias_padded)

    # Drop padded label lanes.
    return out[:, :num_labels]


if __name__ == "__main__":
    # Small shapes consistent with the module: one bag-of-words vector per example.
    batch = 2
    vocab_size = 32
    num_labels = 4

    key = jax.random.PRNGKey(0)
    k_x, k_w, k_b = jax.random.split(key, 3)

    bow_vec = jax.random.uniform(k_x, (batch, vocab_size), dtype=jnp.float32)
    weight = jax.random.normal(k_w, (num_labels, vocab_size), dtype=jnp.float32) * 0.1
    bias = jax.random.normal(k_b, (num_labels,), dtype=jnp.float32) * 0.1

    # Reference (same math as torch forward: log_softmax(linear(x), dim=1)).
    ref = jax.nn.log_softmax(bow_vec @ weight.T + bias, axis=-1)

    # --- f32 path ---
    wt_f32, b_f32 = prepare_params(weight, bias, compute_dtype=jnp.float32)
    out_f32 = jax.block_until_ready(
        bow_classifier_forward(bow_vec, wt_f32, b_f32, num_labels))
    assert out_f32.shape == (batch, num_labels)
    assert jnp.allclose(out_f32, ref, atol=1e-5), "f32 mismatch vs reference"

    # --- bf16 HBM path (x cast in-kernel, f32 accumulation + f32 softmax) ---
    wt_bf16, b_bf16 = prepare_params(weight, bias, compute_dtype=jnp.bfloat16)
    out_bf16 = jax.block_until_ready(
        bow_classifier_forward(bow_vec, wt_bf16, b_bf16, num_labels))
    assert jnp.allclose(out_bf16, ref, atol=5e-2), "bf16 mismatch vs reference"

    print("KERNEL_OK")
</pallas_src>

<mosaic_0001>
module attributes {stable_mosaic.version = 11 : i64} {
  func.func @bow_logsoftmax_kernel(%arg0: i32, %arg1: i32, %arg2: memref<2x32xf32, #tpu.memory_space<vmem>>, %arg3: memref<32x8xf32, #tpu.memory_space<vmem>>, %arg4: memref<1x8xf32, #tpu.memory_space<vmem>>, %arg5: memref<2x8xf32, #tpu.memory_space<vmem>>) attributes {dimension_semantics = [#tpu.dimension_semantics<parallel>, #tpu.dimension_semantics<arbitrary>], iteration_bounds = array<i64: 1, 1>, scalar_prefetch = 0 : i64, scratch_operands = 0 : i64, tpu.core_type = #tpu.core_type<tc>, window_params = [{transform_indices = @transform_0, window_bounds = array<i64: 2, 32>}, {pipeline_mode = #tpu.pipeline_mode<synchronous>, transform_indices = @transform_1, window_bounds = array<i64: 32, 8>}, {pipeline_mode = #tpu.pipeline_mode<synchronous>, transform_indices = @transform_2, window_bounds = array<i64: 1, 8>}, {transform_indices = @transform_3, window_bounds = array<i64: 2, 8>}]} {
    %c0_i32 = arith.constant 0 : i32
    %0 = arith.cmpi eq, %arg1, %c0_i32 : i32
    %1 = arith.extui %0 : i1 to i32
    %c0_i32_0 = arith.constant 0 : i32
    %2 = arith.cmpi ne, %1, %c0_i32_0 : i32
    scf.if %2 {
      %cst_10 = arith.constant 0.000000e+00 : f32
      %12 = vector.broadcast %cst_10 : f32 to vector<2x8xf32>
      %c0_11 = arith.constant 0 : index
      %c0_12 = arith.constant 0 : index
      %13 = vector.load %arg5[%c0_11, %c0_12] : memref<2x8xf32, #tpu.memory_space<vmem>>, vector<2x8xf32>
      tpu.vector_store %arg5[%c0_11, %c0_12], %12 {strides = array<i32>} : memref<2x8xf32, #tpu.memory_space<vmem>>, vector<2x8xf32>,
    } else {
    }
    %c0 = arith.constant 0 : index
    %c0_1 = arith.constant 0 : index
    %3 = vector.load %arg2[%c0, %c0_1] : memref<2x32xf32, #tpu.memory_space<vmem>>, vector<2x32xf32>
    %c0_2 = arith.constant 0 : index
    %c0_3 = arith.constant 0 : index
    %4 = vector.load %arg3[%c0_2, %c0_3] : memref<32x8xf32, #tpu.memory_space<vmem>>, vector<32x8xf32>
    %c0_4 = arith.constant 0 : index
    %c0_5 = arith.constant 0 : index
    %5 = vector.load %arg5[%c0_4, %c0_5] : memref<2x8xf32, #tpu.memory_space<vmem>>, vector<2x8xf32>
    %cst = arith.constant dense<0.000000e+00> : vector<2x8xf32>
    %6 = tpu.matmul %3, %4, %cst {dimension_numbers = #tpu.dot_dimension_numbers<[1], [0], [0], [1], [0, 0, 1, 1], [], []>} : vector<2x32xf32>, vector<32x8xf32>, vector<2x8xf32> -> vector<2x8xf32>
    %7 = arith.addf %5, %6 : vector<2x8xf32>
    %c0_6 = arith.constant 0 : index
    %c0_7 = arith.constant 0 : index
    %8 = vector.load %arg5[%c0_6, %c0_7] : memref<2x8xf32, #tpu.memory_space<vmem>>, vector<2x8xf32>
    tpu.vector_store %arg5[%c0_6, %c0_7], %7 {strides = array<i32>} : memref<2x8xf32, #tpu.memory_space<vmem>>, vector<2x8xf32>,
    %c0_i32_8 = arith.constant 0 : i32
    %9 = arith.cmpi eq, %arg1, %c0_i32_8 : i32
    %10 = arith.extui %9 : i1 to i32
    %c0_i32_9 = arith.constant 0 : i32
    %11 = arith.cmpi ne, %10, %c0_i32_9 : i32
    scf.if %11 {
      %c0_10 = arith.constant 0 : index
      %c0_11 = arith.constant 0 : index
      %12 = vector.load %arg5[%c0_10, %c0_11] : memref<2x8xf32, #tpu.memory_space<vmem>>, vector<2x8xf32>
      %c0_12 = arith.constant 0 : index
      %c0_13 = arith.constant 0 : index
      %13 = vector.load %arg4[%c0_12, %c0_13] : memref<1x8xf32, #tpu.memory_space<vmem>>, vector<1x8xf32>
      %14 = vector.broadcast %13 : vector<1x8xf32> to vector<2x8xf32>
      %15 = arith.addf %12, %14 : vector<2x8xf32>
      %cst_14 = arith.constant dense<0xFF800000> : vector<2xf32>
      %16 = vector.multi_reduction <maximumf>, %15, %cst_14 [1] : vector<2x8xf32> to vector<2xf32>
      %17 = vector.shape_cast %16 : vector<2xf32> to vector<2x1xf32>
      %18 = vector.broadcast %17 : vector<2x1xf32> to vector<2x8xf32>
      %19 = arith.subf %15, %18 : vector<2x8xf32>
      %20 = math.exp %19 : vector<2x8xf32>
      %cst_15 = arith.constant dense<0.000000e+00> : vector<2xf32>
      %21 = vector.multi_reduction <add>, %20, %cst_15 [1] : vector<2x8xf32> to vector<2xf32>
      %22 = vector.shape_cast %21 : vector<2xf32> to vector<2x1xf32>
      %23 = math.log %22 : vector<2x1xf32>
      %24 = vector.broadcast %23 : vector<2x1xf32> to vector<2x8xf32>
      %25 = arith.subf %19, %24 : vector<2x8xf32>
      %c0_16 = arith.constant 0 : index
      %c0_17 = arith.constant 0 : index
      %26 = vector.load %arg5[%c0_16, %c0_17] : memref<2x8xf32, #tpu.memory_space<vmem>>, vector<2x8xf32>
      tpu.vector_store %arg5[%c0_16, %c0_17], %25 {strides = array<i32>} : memref<2x8xf32, #tpu.memory_space<vmem>>, vector<2x8xf32>,
    } else {
    }
    return
  }
  func.func @transform_0(%arg0: i32, %arg1: i32) -> (i32, i32) {
    %c0_i32 = arith.constant 0 : i32
    return %arg0, %arg1 : i32, i32
  }
  func.func @transform_1(%arg0: i32, %arg1: i32) -> (i32, i32) {
    %c0_i32 = arith.constant 0 : i32
    %c0_i32_0 = arith.constant 0 : i32
    %c0_i32_1 = arith.constant 0 : i32
    return %c0_i32, %c0_i32_0 : i32, i32
  }
  func.func @transform_2(%arg0: i32, %arg1: i32) -> (i32, i32) {
    %c0_i32 = arith.constant 0 : i32
    %c0_i32_0 = arith.constant 0 : i32
    %c0_i32_1 = arith.constant 0 : i32
    return %c0_i32, %c0_i32_0 : i32, i32
  }
  func.func @transform_3(%arg0: i32, %arg1: i32) -> (i32, i32) {
    %c0_i32 = arith.constant 0 : i32
    %c0_i32_0 = arith.constant 0 : i32
    return %arg0, %c0_i32 : i32, i32
  }
}

</mosaic_0001>

<bundles_post_ra>
// kernel: bow_classifier_forward.1
= control target key start
LH: loop header
LB: loop body
LE: loop exit
PB: predicated region body
PF: predicated region fallthrough
CT: control target
= control target key end

     0   :  { %v190_v1 = vmov 0.0   ;;  %vm191_vm0 = vmmov 0   ;;  %vm19_vm1 = vcmask 58368   ;;  %s239_s0 = inlined_call_operand.vmem [shape: f32[2,32], index: 0, kind: input, shape index: {}]   ;;  %s240_s1 = inlined_call_operand.vmem [shape: f32[32,8], index: 1, kind: input, shape index: {}]   ;;  %s241_s2 = inlined_call_operand.vmem [shape: f32[1,8], index: 2, kind: input, shape index: {}]   ;;  %s242_s3 = inlined_call_operand.hbm [shape: f32[2,8], index: 3, kind: output, shape index: {}]  }
   0x1   :  { %v25_v0 = vld [vmem:[%s240_s1 + $0x18] sm:$0xff]  ;;  %150 = vmatprep.subr.mxu0 %v190_v1  ;;  %v24_v2 = vld [vmem:[%s240_s1 + $0x10] sm:$0xff]  ;;  %158 = vmatprep.mubr.msk.f32.mxu0 %vm191_vm0, %v190_v1 }
   0x2   :  { %8 = vsyncpa [#allocation3], 0  ;;  %151 = vmatpush3.msra.mxu0 %v25_v0  ;;  %20 = vst.msk [vmem:[#allocation2] sm:$0x3] %vm19_vm1, %v190_v1  ;;  %v23_v3 = vld [vmem:[%s240_s1 + $0x8] sm:$0xff]  ;;  %v22_v4 = vld [vmem:[%s240_s1] sm:$0xff] }
   0x3   :  { %152 = vmatprep.subr.mxu0 %v190_v1  ;;  %v21_v5 = vld [vmem:[%s239_s0] sm:$0x3]  ;;  %vm27_vm2 = vcmask 261120   ;;  %s192_s0 = smov [#allocation2]  }
   0x4   :  { %153 = vmatpush3.msra.mxu0 %v24_v2  ;;  %v144_v10 = vld [vmem:[%s241_s2] ss:$0 sm:$0xff]  ;;  %s135_s1 = sshll.u32 %s192_s0, 4  ;;  %s136_s1 = int_to_ptr.vmem [resolvable:$true] %s135_s1 }
   0x5   :  { %154 = vmatprep.subr.mxu0 %v190_v1  ;;  %s168_s2 = scalar_lea.vmem %s136_s1, 32  ;;  %p173_p1 = scmp.lt.s32.totalorder %s136_s1, %s136_s1 }
   0x6   :  { %155 = vmatpush3.msra.mxu0 %v23_v3  ;;  %p169_p0 = scmp.ne.s32.totalorder %s136_s1, %s168_s2  ;;  %p174_p2 = scmp.lt.s32.totalorder %s168_s2, %s168_s2 }
   0x7   :  { %156 = vmatprep.subr.mxu0 %v190_v1 }
   0x8   :  { %157 = vmatpush3.msra.mxu0 %v22_v4  ;;  %p175_p3 = por %p174_p2, %p173_p1 }
   0x9   :  { %159 = vmatmul.mubr.msk.f32.vlgmr.msra.gmra.mxu0 %vm27_vm2, %v21_v5  ;;  %v26_v6 = vld [vmem:[#allocation2] sm:$0x3] }
   0xa   :  { %p176_p4 = pnand %p175_p3, %p169_p0 }
  0xc9   :  { %v97_v7 = vpop.f32.mrf.mxu0 }
  0xca   :  { %v101_v8 = vadd.f32 %v97_v7, %v26_v6 }
  0xcb   :  { %v160_v9 = vpop.f32.mrf.mxu0 }
  0xcc   :  { %103 = vst.msk [vmem:[#allocation2] sm:$0x3] %vm19_vm1, %v101_v8 }
  0xd3   :  { %v107_v11 = vld [vmem:[#allocation2] sm:$0x3] }
  0xd4   :  { %v115_v12 = vadd.f32 %v144_v10, %v107_v11 }
  0xd6   :  { %v116_v13 = vsel %vm19_vm1, %v115_v12, -inf }
  0xd7   :  { %117 = vmax.xlane.f32.xlu0 %v116_v13 }
 0x160   :  { %v118_v14 = vpop.xlane.xlu0 %117 }
 0x161   :  { %v119_v15 = vsub.f32 %v115_v12, %v118_v14 }
 0x163   :  { %v120_v16 = vmul.f32 1.442695, %v119_v15 }
 0x165   :  { %164 = vpow2.f32 %v120_v16 }
 0x172   :  { %v165_v17 = vpop.eup %164 }
 0x173   :  { %v122_v18 = vsel %vm19_vm1, %v165_v17, 0.0 }
 0x174   :  { %123 = vadd.xlane.f32.xlu0 %v122_v18 }
 0x1fd   :  { %v124_v19 = vpop.xlane.xlu0 %123 }
 0x1fe   :  { %166 = vlog2.f32 %v124_v19 }
 0x20b   :  { %v167_v20 = vpop.eup %166 }
 0x20c   :  { %v126_v21 = vmul.f32 0.6931472, %v167_v20 }
 0x20e   :  { %v127_v22 = vsub.f32 %v119_v15, %v126_v21 }
 0x210   :  { %128 = vst.msk [vmem:[#allocation2] sm:$0x3] %vm19_vm1, %v127_v22 }
 0x211   :  { %179 = shalt.err (!%p176_p4)
}
 0x212   :  { %138 = dma.vmem_to_hbm [thread:$0]  %s136_s1, 32, %s242_s3, [#allocation3]  }
 0x213   :  { %188 = dma.done.wait [#allocation3], 32  }
 0x214   :  { %189 = vsyncadd [#allocation3], 4294967264 }
 0x215   :  { %142 = vsyncpa [#allocation3], 1 }

</bundles_post_ra>
